<compile_context>
chip_gen: v7x
topology: tpu7x:2x2x1
jax: 0.10.0
libtpu: 0.0.40
codegen_flags: <defaults>
</compile_context>

<pallas_src>
import jax
import jax.numpy as jnp
from jax.experimental import pallas as pl
from jax.experimental.pallas import tpu as pltpu


# ----------------------------------------------------------------------------
# Parameter slab layout (every parameter starts on an 8-row boundary).
# ----------------------------------------------------------------------------
def _align8(n):
    return (n + 7) // 8 * 8


_PARAM_ORDER = ("w1", "b1", "w2", "b2", "w3", "b3",
                "lw1a", "lw1b", "lw1c", "lb1", "lw2", "lb2")


def _param_layout(f_in, latent, hidden):
    sizes = [("w1", f_in), ("b1", 1),
             ("w2", latent), ("b2", 1),
             ("w3", latent), ("b3", 1),
             ("lw1a", latent), ("lw1b", latent), ("lw1c", latent),
             ("lb1", 1),
             ("lw2", hidden), ("lb2", 1)]
    rows, r = {}, 0
    for name, nrows in sizes:
        rows[name] = r
        r += _align8(nrows)
    return rows, r


def pack_params(params, rows, total_rows, latent):
    """Pack all weights/biases into one (total_rows, 128) f32 slab.

    linear1's (3L, H) weight is split into its three L-row blocks so the
    kernel never has to build a 3L (=96, non-128) lane concat.
    Lanes beyond each parameter's true width stay exactly zero; the loss math
    relies on that for the lane-padded lw2 / lb2 / y columns.
    """
    L = latent
    pieces = dict(params)
    lw1 = jnp.asarray(params["lw1"], jnp.float32)
    pieces["lw1a"] = lw1[0 * L:1 * L]
    pieces["lw1b"] = lw1[1 * L:2 * L]
    pieces["lw1c"] = lw1[2 * L:3 * L]

    slab = jnp.zeros((total_rows, 128), jnp.float32)
    for name in _PARAM_ORDER:
        arr = jnp.asarray(pieces[name], jnp.float32)
        nr, nc = arr.shape
        r0 = rows[name]
        slab = slab.at[r0:r0 + nr, 0:nc].set(arr)
    return slab


# ----------------------------------------------------------------------------
# Kernel
# ----------------------------------------------------------------------------
def _make_kernel(B, N, f_in, L, H, rows):
    r_w1, r_b1 = rows["w1"], rows["b1"]
    r_w2, r_b2 = rows["w2"], rows["b2"]
    r_w3, r_b3 = rows["w3"], rows["b3"]
    r_lw1a, r_lw1b, r_lw1c = rows["lw1a"], rows["lw1b"], rows["lw1c"]
    r_lb1, r_lw2, r_lb2 = rows["lb1"], rows["lw2"], rows["lb2"]
    inv_b = 1.0 / float(B)
    out_rows = _align8(B + 2)
    pad_rows = out_rows - (B + 2)

    def kernel(idx_ref, adj_ref, x_ref, p_ref, y_ref, out_ref):
        adj = adj_ref[...]                       # (N, N) bf16 normalized adjacency
        x = x_ref[...]                           # (N, f_in) bf16

        # Weight slices from the packed f32 slab, cast once to bf16 for the
        # MXU (tiny VALU cost at these sizes); biases stay f32.
        def wbf(r0, nr, nc):
            return p_ref[r0:r0 + nr, 0:nc].astype(jnp.bfloat16)

        w1 = wbf(r_w1, f_in, L)
        w2 = wbf(r_w2, L, L)
        w3 = wbf(r_w3, L, L)
        lw1a = wbf(r_lw1a, L, H)
        lw1b = wbf(r_lw1b, L, H)
        lw1c = wbf(r_lw1c, L, H)
        lw2 = p_ref[r_lw2:r_lw2 + H, :].astype(jnp.bfloat16)  # (H,128), col 0 real
        b1 = p_ref[r_b1:r_b1 + 1, 0:L]
        b2 = p_ref[r_b2:r_b2 + 1, 0:L]
        b3 = p_ref[r_b3:r_b3 + 1, 0:L]
        lb1 = p_ref[r_lb1:r_lb1 + 1, 0:H]
        lb2 = p_ref[r_lb2:r_lb2 + 1, :]                        # (1,128) f32

        # One-hot readout selector built from the first-node indices:
        # sel[g, n] = 1 iff n is the first node of graph g.
        idx_col = idx_ref[...]                                 # (B, 1) int32
        iota = jax.lax.broadcasted_iota(jnp.int32, (B, N), 1)  # (B, N)
        sel = (iota == idx_col).astype(jnp.bfloat16)           # (B, N) one-hot

        # GCN layer 1, reassociated: (A @ X) @ W1   (f_in < L -> fewer MACs).
        ax = jnp.dot(adj, x, preferred_element_type=jnp.float32)        # (N,f_in)
        h1 = jnp.tanh(jnp.dot(ax.astype(jnp.bfloat16), w1,
                              preferred_element_type=jnp.float32) + b1)  # (N,L) f32
        h1_bf = h1.astype(jnp.bfloat16)

        def gcn(h_bf, w, b):
            hw = jnp.dot(h_bf, w, preferred_element_type=jnp.float32)    # (N,L)
            agg = jnp.dot(adj, hw.astype(jnp.bfloat16),
                          preferred_element_type=jnp.float32)            # (N,L)
            return jnp.tanh(agg + b)

        h2 = gcn(h1_bf, w2, b2)
        h2_bf = h2.astype(jnp.bfloat16)
        h3 = gcn(h2_bf, w3, b3)
        h3_bf = h3.astype(jnp.bfloat16)

        # Readout per layer via the one-hot matmul (exact row selection);
        # the 3L concat is never materialized.
        g1 = jnp.dot(sel, h1_bf, preferred_element_type=jnp.float32).astype(jnp.bfloat16)
        g2 = jnp.dot(sel, h2_bf, preferred_element_type=jnp.float32).astype(jnp.bfloat16)
        g3 = jnp.dot(sel, h3_bf, preferred_element_type=jnp.float32).astype(jnp.bfloat16)

        # linear1 reassociated over the three concat blocks, then ReLU.
        hidden = (jnp.dot(g1, lw1a, preferred_element_type=jnp.float32)
                  + jnp.dot(g2, lw1b, preferred_element_type=jnp.float32)
                  + jnp.dot(g3, lw1c, preferred_element_type=jnp.float32)
                  + lb1)                                                 # (B,H) f32
        hidden = jnp.maximum(hidden, 0.0)
        # TODO(synk): with_dropout=True training path (F.dropout) not implemented.

        # linear2, lane-padded: col 0 is the real prediction, cols 1.. stay 0
        # because lw2/lb2/y_pad lanes 1..127 are exactly zero in the slab.
        pred_full = jnp.dot(hidden.astype(jnp.bfloat16), lw2,
                            preferred_element_type=jnp.float32) + lb2   # (B,128)

        diff = pred_full - y_ref[...]                                   # (B,128)
        sq = diff * diff
        mse = jnp.sum(jnp.sum(sq, axis=1, keepdims=True),
                      axis=0, keepdims=True) * inv_b                    # (1,1)
        mae = jnp.sum(jnp.sum(jnp.abs(diff), axis=1, keepdims=True),
                      axis=0, keepdims=True) * inv_b                    # (1,1)

        # Assemble the whole output tile in registers; one unmasked store.
        rows_out = [pred_full,
                    jnp.broadcast_to(mse, (1, 128)),
                    jnp.broadcast_to(mae, (1, 128))]
        if pad_rows:
            rows_out.append(jnp.zeros((pad_rows, 128), jnp.float32))
        out_ref[...] = jnp.concatenate(rows_out, axis=0)

    return kernel, out_rows


# ----------------------------------------------------------------------------
# Wrapper (everything per-call lives inside one jit)
# ----------------------------------------------------------------------------
def make_net_forward(f_in, latent, hidden):
    """Returns (jitted forward, rows, total_rows) for the given sizes."""
    L, H = latent, hidden
    rows, total_rows = _param_layout(f_in, L, H)

    @jax.jit
    def forward(adj_norm, x, slab, first_idx, y):
        N = adj_norm.shape[0]
        B = first_idx.shape[0]

        kernel, out_rows = _make_kernel(B=B, N=N, f_in=f_in, L=L, H=H, rows=rows)

        adj_bf = adj_norm.astype(jnp.bfloat16)
        x_bf = x.astype(jnp.bfloat16)
        idx_col = first_idx.astype(jnp.int32).reshape(B, 1)
        y_pad = jnp.zeros((B, 128), jnp.float32).at[:, 0:1].set(
            jnp.asarray(y, jnp.float32).reshape(B, 1))

        vspec = pl.BlockSpec(memory_space=pltpu.MemorySpace.VMEM)

        out = pl.pallas_call(
            kernel,
            out_shape=jax.ShapeDtypeStruct((out_rows, 128), jnp.float32),
            in_specs=[vspec, vspec, vspec, vspec, vspec],
            out_specs=vspec,
        )(idx_col, adj_bf, x_bf, slab, y_pad)

        pred = out[0:B, 0]
        mse = out[B, 0]
        mae = out[B + 1, 0]
        return pred, mse, mae

    return forward, rows, total_rows


def gcn_normalized_adjacency(edge_index, num_nodes):
    # Dense A, add self-loops, symmetric normalization (PyG GCNConv default).
    src, dst = edge_index
    a = jnp.zeros((num_nodes, num_nodes), jnp.float32).at[src, dst].set(1.0)
    a_hat = a + jnp.eye(num_nodes, dtype=jnp.float32)
    deg = a_hat.sum(axis=1)
    d_inv_sqrt = jnp.where(deg > 0, 1.0 / jnp.sqrt(deg), 0.0)
    return d_inv_sqrt[:, None] * a_hat * d_inv_sqrt[None, :]


if __name__ == "__main__":
    # Small deterministic problem: B=4 graphs, 8 nodes each (N=32),
    # input_dim=8, latent_dim=[32,32,32], hidden_size=32.
    B, nodes_per_graph = 4, 8
    N = B * nodes_per_graph
    input_dim, hidden_size = 8, 32
    latent = [32, 32, 32]

    # Ring graph inside each component (undirected -> both directions).
    src, dst = [], []
    for g in range(B):
        base = g * nodes_per_graph
        for i in range(nodes_per_graph):
            j = (i + 1) % nodes_per_graph
            src += [base + i, base + j]
            dst += [base + j, base + i]
    edge_index = jnp.array([src, dst], dtype=jnp.int32)
    batch = jnp.repeat(jnp.arange(B, dtype=jnp.int32), nodes_per_graph)

    key = jax.random.PRNGKey(0)
    ks = jax.random.split(key, 10)
    scale = 0.1
    params = {
        "w1": scale * jax.random.normal(ks[0], (input_dim, latent[0]), jnp.float32),
        "b1": jnp.zeros((1, latent[0]), jnp.float32),
        "w2": scale * jax.random.normal(ks[1], (latent[0], latent[1]), jnp.float32),
        "b2": jnp.zeros((1, latent[1]), jnp.float32),
        "w3": scale * jax.random.normal(ks[2], (latent[1], latent[2]), jnp.float32),
        "b3": jnp.zeros((1, latent[2]), jnp.float32),
        # linear1: (sum(latent)=96) -> hidden
        "lw1": scale * jax.random.normal(ks[3], (sum(latent), hidden_size), jnp.float32),
        "lb1": scale * jax.random.normal(ks[4], (1, hidden_size), jnp.float32),
        # linear2: hidden -> 1
        "lw2": scale * jax.random.normal(ks[5], (hidden_size, 1), jnp.float32),
        "lb2": scale * jax.random.normal(ks[6], (1, 1), jnp.float32),
    }

    x = jax.random.normal(ks[7], (N, input_dim), jnp.float32)
    y = jax.random.normal(jax.random.PRNGKey(42), (B,), jnp.float32)

    # One-time (per-model) setup, hoisted out of the per-call path.
    forward, rows, total_rows = make_net_forward(input_dim, latent[0], hidden_size)
    slab = pack_params(params, rows, total_rows, latent[0])
    adj_norm = gcn_normalized_adjacency(edge_index, N)
    # First node index of each graph (torch.unique(batch) + first nonzero),
    # computed as one vectorized op (no per-graph host syncs).
    first_idx = jnp.argmax(batch[None, :] == jnp.arange(B, dtype=jnp.int32)[:, None],
                           axis=1).astype(jnp.int32)

    pred, mse, mae = forward(adj_norm, x, slab, first_idx, y)
    jax.block_until_ready((pred, mse, mae))
    print("KERNEL_OK")
</pallas_src>

<mosaic_0001>
module attributes {stable_mosaic.version = 11 : i64} {
  func.func @kernel(%arg0: memref<4x1xi32, #tpu.memory_space<vmem>>, %arg1: memref<32x32xbf16, #tpu.memory_space<vmem>>, %arg2: memref<32x8xbf16, #tpu.memory_space<vmem>>, %arg3: memref<240x128xf32, #tpu.memory_space<vmem>>, %arg4: memref<4x128xf32, #tpu.memory_space<vmem>>, %arg5: memref<8x128xf32, #tpu.memory_space<vmem>>) attributes {dimension_semantics = [], scalar_prefetch = 0 : i64, scratch_operands = 0 : i64, tpu.core_type = #tpu.core_type<tc>} {
    %c0 = arith.constant 0 : index
    %c0_0 = arith.constant 0 : index
    %0 = vector.load %arg1[%c0, %c0_0] : memref<32x32xbf16, #tpu.memory_space<vmem>>, vector<32x32xbf16>
    %c0_1 = arith.constant 0 : index
    %c0_2 = arith.constant 0 : index
    %1 = vector.load %arg2[%c0_1, %c0_2] : memref<32x8xbf16, #tpu.memory_space<vmem>>, vector<32x8xbf16>
    %c0_3 = arith.constant 0 : index
    %c0_4 = arith.constant 0 : index
    %2 = vector.load %arg3[%c0_3, %c0_4] : memref<240x128xf32, #tpu.memory_space<vmem>>, vector<8x32xf32>
    %3 = arith.truncf %2 : vector<8x32xf32> to vector<8x32xbf16>
    %c16 = arith.constant 16 : index
    %c0_5 = arith.constant 0 : index
    %4 = vector.load %arg3[%c16, %c0_5] : memref<240x128xf32, #tpu.memory_space<vmem>>, vector<32x32xf32>
    %5 = arith.truncf %4 : vector<32x32xf32> to vector<32x32xbf16>
    %c56 = arith.constant 56 : index
    %c0_6 = arith.constant 0 : index
    %6 = vector.load %arg3[%c56, %c0_6] : memref<240x128xf32, #tpu.memory_space<vmem>>, vector<32x32xf32>
    %7 = arith.truncf %6 : vector<32x32xf32> to vector<32x32xbf16>
    %c96 = arith.constant 96 : index
    %c0_7 = arith.constant 0 : index
    %8 = vector.load %arg3[%c96, %c0_7] : memref<240x128xf32, #tpu.memory_space<vmem>>, vector<32x32xf32>
    %9 = arith.truncf %8 : vector<32x32xf32> to vector<32x32xbf16>
    %c128 = arith.constant 128 : index
    %c0_8 = arith.constant 0 : index
    %10 = vector.load %arg3[%c128, %c0_8] : memref<240x128xf32, #tpu.memory_space<vmem>>, vector<32x32xf32>
    %11 = arith.truncf %10 : vector<32x32xf32> to vector<32x32xbf16>
    %c160 = arith.constant 160 : index
    %c0_9 = arith.constant 0 : index
    %12 = vector.load %arg3[%c160, %c0_9] : memref<240x128xf32, #tpu.memory_space<vmem>>, vector<32x32xf32>
    %13 = arith.truncf %12 : vector<32x32xf32> to vector<32x32xbf16>
    %c200 = arith.constant 200 : index
    %c0_10 = arith.constant 0 : index
    %14 = vector.load %arg3[%c200, %c0_10] : memref<240x128xf32, #tpu.memory_space<vmem>>, vector<32x128xf32>
    %15 = arith.truncf %14 : vector<32x128xf32> to vector<32x128xbf16>
    %c8 = arith.constant 8 : index
    %c0_11 = arith.constant 0 : index
    %16 = vector.load %arg3[%c8, %c0_11] : memref<240x128xf32, #tpu.memory_space<vmem>>, vector<1x32xf32>
    %c48 = arith.constant 48 : index
    %c0_12 = arith.constant 0 : index
    %17 = vector.load %arg3[%c48, %c0_12] : memref<240x128xf32, #tpu.memory_space<vmem>>, vector<1x32xf32>
    %c88 = arith.constant 88 : index
    %c0_13 = arith.constant 0 : index
    %18 = vector.load %arg3[%c88, %c0_13] : memref<240x128xf32, #tpu.memory_space<vmem>>, vector<1x32xf32>
    %c192 = arith.constant 192 : index
    %c0_14 = arith.constant 0 : index
    %19 = vector.load %arg3[%c192, %c0_14] : memref<240x128xf32, #tpu.memory_space<vmem>>, vector<1x32xf32>
    %c232 = arith.constant 232 : index
    %c0_15 = arith.constant 0 : index
    %20 = vector.load %arg3[%c232, %c0_15] : memref<240x128xf32, #tpu.memory_space<vmem>>, vector<1x128xf32>
    %c0_16 = arith.constant 0 : index
    %c0_17 = arith.constant 0 : index
    %21 = vector.load %arg0[%c0_16, %c0_17] : memref<4x1xi32, #tpu.memory_space<vmem>>, vector<4x1xi32>
    %22 = tpu.iota {dimensions = array<i32: 1>} : vector<4x32xi32>
    %23 = vector.broadcast %21 : vector<4x1xi32> to vector<4x32xi32>
    %24 = arith.cmpi eq, %22, %23 : vector<4x32xi32>
    %25 = arith.extui %24 : vector<4x32xi1> to vector<4x32xi32>
    %26 = arith.sitofp %25 : vector<4x32xi32> to vector<4x32xf32>
    %27 = arith.truncf %26 : vector<4x32xf32> to vector<4x32xbf16>
    %cst = arith.constant dense<0.000000e+00> : vector<32x8xf32>
    %28 = tpu.matmul %0, %1, %cst {dimension_numbers = #tpu.dot_dimension_numbers<[1], [0], [0], [1], [0, 0, 1, 1], [], []>} : vector<32x32xbf16>, vector<32x8xbf16>, vector<32x8xf32> -> vector<32x8xf32>
    %29 = arith.truncf %28 : vector<32x8xf32> to vector<32x8xbf16>
    %cst_18 = arith.constant dense<0.000000e+00> : vector<32x32xf32>
    %30 = tpu.matmul %29, %3, %cst_18 {dimension_numbers = #tpu.dot_dimension_numbers<[1], [0], [0], [1], [0, 0, 1, 1], [], []>} : vector<32x8xbf16>, vector<8x32xbf16>, vector<32x32xf32> -> vector<32x32xf32>
    %31 = vector.broadcast %16 : vector<1x32xf32> to vector<32x32xf32>
    %32 = arith.addf %30, %31 : vector<32x32xf32>
    %33 = math.tanh %32 : vector<32x32xf32>
    %34 = arith.truncf %33 : vector<32x32xf32> to vector<32x32xbf16>
    %cst_19 = arith.constant dense<0.000000e+00> : vector<32x32xf32>
    %35 = tpu.matmul %34, %5, %cst_19 {dimension_numbers = #tpu.dot_dimension_numbers<[1], [0], [0], [1], [0, 0, 1, 1], [], []>} : vector<32x32xbf16>, vector<32x32xbf16>, vector<32x32xf32> -> vector<32x32xf32>
    %36 = arith.truncf %35 : vector<32x32xf32> to vector<32x32xbf16>
    %cst_20 = arith.constant dense<0.000000e+00> : vector<32x32xf32>
    %37 = tpu.matmul %0, %36, %cst_20 {dimension_numbers = #tpu.dot_dimension_numbers<[1], [0], [0], [1], [0, 0, 1, 1], [], []>} : vector<32x32xbf16>, vector<32x32xbf16>, vector<32x32xf32> -> vector<32x32xf32>
    %38 = vector.broadcast %17 : vector<1x32xf32> to vector<32x32xf32>
    %39 = arith.addf %37, %38 : vector<32x32xf32>
    %40 = math.tanh %39 : vector<32x32xf32>
    %41 = arith.truncf %40 : vector<32x32xf32> to vector<32x32xbf16>
    %cst_21 = arith.constant dense<0.000000e+00> : vector<32x32xf32>
    %42 = tpu.matmul %41, %7, %cst_21 {dimension_numbers = #tpu.dot_dimension_numbers<[1], [0], [0], [1], [0, 0, 1, 1], [], []>} : vector<32x32xbf16>, vector<32x32xbf16>, vector<32x32xf32> -> vector<32x32xf32>
    %43 = arith.truncf %42 : vector<32x32xf32> to vector<32x32xbf16>
    %cst_22 = arith.constant dense<0.000000e+00> : vector<32x32xf32>
    %44 = tpu.matmul %0, %43, %cst_22 {dimension_numbers = #tpu.dot_dimension_numbers<[1], [0], [0], [1], [0, 0, 1, 1], [], []>} : vector<32x32xbf16>, vector<32x32xbf16>, vector<32x32xf32> -> vector<32x32xf32>
    %45 = vector.broadcast %18 : vector<1x32xf32> to vector<32x32xf32>
    %46 = arith.addf %44, %45 : vector<32x32xf32>
    %47 = math.tanh %46 : vector<32x32xf32>
    %48 = arith.truncf %47 : vector<32x32xf32> to vector<32x32xbf16>
    %cst_23 = arith.constant dense<0.000000e+00> : vector<4x32xf32>
    %49 = tpu.matmul %27, %34, %cst_23 {dimension_numbers = #tpu.dot_dimension_numbers<[1], [0], [0], [1], [0, 0, 1, 1], [], []>} : vector<4x32xbf16>, vector<32x32xbf16>, vector<4x32xf32> -> vector<4x32xf32>
    %50 = arith.truncf %49 : vector<4x32xf32> to vector<4x32xbf16>
    %cst_24 = arith.constant dense<0.000000e+00> : vector<4x32xf32>
    %51 = tpu.matmul %27, %41, %cst_24 {dimension_numbers = #tpu.dot_dimension_numbers<[1], [0], [0], [1], [0, 0, 1, 1], [], []>} : vector<4x32xbf16>, vector<32x32xbf16>, vector<4x32xf32> -> vector<4x32xf32>
    %52 = arith.truncf %51 : vector<4x32xf32> to vector<4x32xbf16>
    %cst_25 = arith.constant dense<0.000000e+00> : vector<4x32xf32>
    %53 = tpu.matmul %27, %48, %cst_25 {dimension_numbers = #tpu.dot_dimension_numbers<[1], [0], [0], [1], [0, 0, 1, 1], [], []>} : vector<4x32xbf16>, vector<32x32xbf16>, vector<4x32xf32> -> vector<4x32xf32>
    %54 = arith.truncf %53 : vector<4x32xf32> to vector<4x32xbf16>
    %cst_26 = arith.constant dense<0.000000e+00> : vector<4x32xf32>
    %55 = tpu.matmul %50, %9, %cst_26 {dimension_numbers = #tpu.dot_dimension_numbers<[1], [0], [0], [1], [0, 0, 1, 1], [], []>} : vector<4x32xbf16>, vector<32x32xbf16>, vector<4x32xf32> -> vector<4x32xf32>
    %cst_27 = arith.constant dense<0.000000e+00> : vector<4x32xf32>
    %56 = tpu.matmul %52, %11, %cst_27 {dimension_numbers = #tpu.dot_dimension_numbers<[1], [0], [0], [1], [0, 0, 1, 1], [], []>} : vector<4x32xbf16>, vector<32x32xbf16>, vector<4x32xf32> -> vector<4x32xf32>
    %57 = arith.addf %55, %56 : vector<4x32xf32>
    %cst_28 = arith.constant dense<0.000000e+00> : vector<4x32xf32>
    %58 = tpu.matmul %54, %13, %cst_28 {dimension_numbers = #tpu.dot_dimension_numbers<[1], [0], [0], [1], [0, 0, 1, 1], [], []>} : vector<4x32xbf16>, vector<32x32xbf16>, vector<4x32xf32> -> vector<4x32xf32>
    %59 = arith.addf %57, %58 : vector<4x32xf32>
    %60 = vector.broadcast %19 : vector<1x32xf32> to vector<4x32xf32>
    %61 = arith.addf %59, %60 : vector<4x32xf32>
    %cst_29 = arith.constant 0.000000e+00 : f32
    %62 = vector.broadcast %cst_29 : f32 to vector<4x32xf32>
    %63 = arith.maximumf %61, %62 : vector<4x32xf32>
    %64 = arith.truncf %63 : vector<4x32xf32> to vector<4x32xbf16>
    %cst_30 = arith.constant dense<0.000000e+00> : vector<4x128xf32>
    %65 = tpu.matmul %64, %15, %cst_30 {dimension_numbers = #tpu.dot_dimension_numbers<[1], [0], [0], [1], [0, 0, 1, 1], [], []>} : vector<4x32xbf16>, vector<32x128xbf16>, vector<4x128xf32> -> vector<4x128xf32>
    %66 = vector.broadcast %20 : vector<1x128xf32> to vector<4x128xf32>
    %67 = arith.addf %65, %66 : vector<4x128xf32>
    %c0_31 = arith.constant 0 : index
    %c0_32 = arith.constant 0 : index
    %68 = vector.load %arg4[%c0_31, %c0_32] : memref<4x128xf32, #tpu.memory_space<vmem>>, vector<4x128xf32>
    %69 = arith.subf %67, %68 : vector<4x128xf32>
    %70 = arith.mulf %69, %69 : vector<4x128xf32>
    %cst_33 = arith.constant dense<0.000000e+00> : vector<4xf32>
    %71 = vector.multi_reduction <add>, %70, %cst_33 [1] : vector<4x128xf32> to vector<4xf32>
    %72 = vector.shape_cast %71 : vector<4xf32> to vector<4x1xf32>
    %cst_34 = arith.constant dense<0.000000e+00> : vector<1xf32>
    %73 = vector.multi_reduction <add>, %72, %cst_34 [0] : vector<4x1xf32> to vector<1xf32>
    %74 = vector.shape_cast %73 : vector<1xf32> to vector<1x1xf32>
    %cst_35 = arith.constant 2.500000e-01 : f32
    %75 = vector.broadcast %cst_35 : f32 to vector<1x1xf32>
    %76 = arith.mulf %74, %75 : vector<1x1xf32>
    %77 = math.absf %69 : vector<4x128xf32>
    %cst_36 = arith.constant dense<0.000000e+00> : vector<4xf32>
    %78 = vector.multi_reduction <add>, %77, %cst_36 [1] : vector<4x128xf32> to vector<4xf32>
    %79 = vector.shape_cast %78 : vector<4xf32> to vector<4x1xf32>
    %cst_37 = arith.constant dense<0.000000e+00> : vector<1xf32>
    %80 = vector.multi_reduction <add>, %79, %cst_37 [0] : vector<4x1xf32> to vector<1xf32>
    %81 = vector.shape_cast %80 : vector<1xf32> to vector<1x1xf32>
    %cst_38 = arith.constant 2.500000e-01 : f32
    %82 = vector.broadcast %cst_38 : f32 to vector<1x1xf32>
    %83 = arith.mulf %81, %82 : vector<1x1xf32>
    %84 = vector.shape_cast %76 : vector<1x1xf32> to vector<1x1xf32>
    %85 = vector.broadcast %84 : vector<1x1xf32> to vector<1x128xf32>
    %86 = vector.shape_cast %83 : vector<1x1xf32> to vector<1x1xf32>
    %87 = vector.broadcast %86 : vector<1x1xf32> to vector<1x128xf32>
    %cst_39 = arith.constant 0.000000e+00 : f32
    %88 = vector.broadcast %cst_39 : f32 to vector<2x128xf32>
    %89 = tpu.concatenate %67, %85, %87, %88 in 0 : vector<4x128xf32>, vector<1x128xf32>, vector<1x128xf32>, vector<2x128xf32> -> vector<8x128xf32>
    %c0_40 = arith.constant 0 : index
    %c0_41 = arith.constant 0 : index
    %90 = vector.load %arg5[%c0_40, %c0_41] : memref<8x128xf32, #tpu.memory_space<vmem>>, vector<8x128xf32>
    tpu.vector_store %arg5[%c0_40, %c0_41], %89 {strides = array<i32>} : memref<8x128xf32, #tpu.memory_space<vmem>>, vector<8x128xf32>,
    return
  }
}

</mosaic_0001>

<bundles_post_ra>
// kernel: forward.1
= control target key start
LH: loop header
LB: loop body
LE: loop exit
PB: predicated region body
PF: predicated region fallthrough
CT: control target
= control target key end

     0   :  { %10 = vsyncpa [#allocation3], 0  ;;  %s1060_s18 = smov [#allocation2]   ;;  %s1192_s0 = inlined_call_operand.vmem [shape: s32[4,1], index: 0, kind: input, shape index: {}]   ;;  %s1193_s1 = inlined_call_operand.vmem [shape: bf16[32,32], index: 1, kind: input, shape index: {}]   ;;  %s1194_s2 = inlined_call_operand.vmem [shape: bf16[32,8], index: 2, kind: input, shape index: {}]   ;;  %s1195_s3 = inlined_call_operand.hbm [shape: f32[240,128], index: 3, kind: input, shape index: {}]   ;;  %s1196_s4 = inlined_call_operand.vmem [shape: f32[4,128], index: 4, kind: input, shape index: {}]   ;;  %s1197_s5 = inlined_call_operand.vmem [shape: f32[8,128], index: 5, kind: output, shape index: {}]  }
   0x1   :  { %s22_s19 = sshll.u32 %s1060_s18, 4  ;;  %s1036_s22 = scalar_lea.hbm %s1195_s3, 3840  ;;  %s23_s19 = int_to_ptr.vmem [resolvable:$true] %s22_s19 }
   0x2   :  { %p1037_p0 = scmp.ne.s32.totalorder %s1195_s3, %s1036_s22  ;;  %p1040_p1 = scmp.lt.u32.totalorder %s1036_s22, %s1195_s3 }
   0x4   :  { %p1042_p2 = pnand %p1040_p1, %p1037_p0 }
   0x6   :  { %1045 = shalt.err (!%p1042_p2)
}
   0x7   :  { %s1046_s27 = scalar_lea.vmem %s23_s19, 3840  ;;  %p1051_p4 = scmp.lt.s32.totalorder %s23_s19, %s23_s19 }
   0x8   :  { %p1047_p3 = scmp.ne.s32.totalorder %s23_s19, %s1046_s27  ;;  %p1052_p5 = scmp.lt.s32.totalorder %s1046_s27, %s1046_s27 }
   0xa   :  { %p1053_p6 = por %p1052_p5, %p1051_p4 }
   0xc   :  { %p1054_p7 = pnand %p1053_p6, %p1047_p3 }
   0xe   :  { %1057 = shalt.err (!%p1054_p7)
}
   0xf   :  { %s1061_s28 = smov 128   ;;  %s1062_s29 = smov 8  }
  0x10   :  { %28 = dma.hbm_to_vmem [thread:$0]  %s1195_s3, 3840, %s23_s19, [#allocation3], %s1061_s28, %s1061_s28, %s1062_s29  }
  0x11   :  { %1058 = dma.done.wait [#allocation3], 3840  }
  0x12   :  { %1059 = vsyncadd [#allocation3], 4294963456  ;;  %v1008_v0 = vld [vmem:[%s1194_s2] sm:$0xff]   ;;  %v1009_v1 = vld [vmem:[%s1194_s2 + $0x8] sm:$0xff]   ;;  %vm118_vm0 = vcmask 261120   ;;  %vm187_vm1 = vcmask 1043456  }
  0x13   :  { %898 = vmatprep.subr.bf16.mxu0 %v1008_v0  ;;  %v1117_v2 = vld [vmem:[%s1193_s1] sm:$0xff]   ;;  %v1124_v3 = vld [vmem:[%s1193_s1 + $0x8] sm:$0xff]   ;;  %vm180_vm2 = vcmask 64512   ;;  %v45_v13 = vld [vmem:[#allocation2 + $0x10] sm:$0xff]  ;;  %v1063_v46 = vmov 0.0   ;;  %v1064_v63 = vmov 0  }
  0x14   :  { %899 = vmatpush3.bf16.msra.mxu0 %v1008_v0  ;;  %902 = vmatprep.mubr.msk.bf16.mxu0 %vm118_vm0, %v1117_v2  ;;  %v43_v4 = vld [vmem:[#allocation2] sm:$0xff]  ;;  %v46_v14 = vld [vmem:[#allocation2 + $0x18] sm:$0xff]  ;;  %v48_v17 = vld [vmem:[#allocation2 + $0x28] sm:$0xff]  ;;  %vm1065_vm3 = vmmov 0   ;;  %vm815_vm5 = vcmask 1044480   ;;  %vm817_vm6 = vcmask 1045504  }
  0x15   :  { %900 = vmatprep.subr.bf16.mxu0 %v1009_v1  ;;  %v44_v5 = vpack.c.bf16 %v43_v4, %v43_v4  ;;  %v47_v15 = vld [vmem:[#allocation2 + $0x20] sm:$0xff]  ;;  %v49_v16 = vpack.c.bf16 %v46_v14, %v45_v13  ;;  %v832_v19 = vld [vmem:[#allocation2 + $0x8] ss:$0 sm:$0xff]  ;;  %v51_v40 = vld [vmem:[#allocation2 + $0x38] sm:$0xff]  ;;  %1007 = vset.pattern.permute.xlu0 %v1064_v63 }
  0x16   :  { %v50_v18 = vpack.c.bf16 %v48_v17, %v47_v15  ;;  %v52_v41 = vld [vmem:[#allocation2 + $0x40] sm:$0xff]  ;;  %v53_v42 = vld [vmem:[#allocation2 + $0x48] sm:$0xff]  ;;  %v54_v44 = vld [vmem:[#allocation2 + $0x50] sm:$0xff] }
  0x17   :  { %1000 = vmatprep.subr.msk.bf16.mxu1 %vm187_vm1, %v44_v5  ;;  %v189_v6 = vsel %vm187_vm1, %v44_v5, 0  ;;  %v55_v43 = vpack.c.bf16 %v52_v41, %v51_v40  ;;  %v56_v45 = vpack.c.bf16 %v54_v44, %v53_v42  ;;  %v837_v47 = vld [vmem:[#allocation2 + $0x30] ss:$0 sm:$0xff]  ;;  %v86_v62 = vld [vmem:[%s1192_s0] sm:$0xf]  ;;  %v66_v15 = vld [vmem:[#allocation2 + $0x98] sm:$0xff] }
  0x18   :  { %901 = vmatpush3.bf16.msra.mxu0 %v1009_v1  ;;  %907 = vmatpush3.bf16.msra.mxu1 %v189_v6  ;;  %v65_v14 = vld [vmem:[#allocation2 + $0x90] sm:$0xff]  ;;  %v842_v17 = vld [vmem:[#allocation2 + $0x58] ss:$0 sm:$0xff] }
  0x19   :  { %912 = vmatprep.subr.bf16.mxu1 %v49_v16  ;;  %90 = vperm.xlu0 %1007, %v86_v62  }
  0x1b   :  { %903 = vmatmul.mubr.msk.bf16.vlgmr.msra.gmra.mrb[0].mxu0 %vm118_vm0, %v1124_v3 }
  0x1c   :  { %924 = vmatprep.mubr.msk.bf16.mxu0 %vm118_vm0, %v1117_v2 }
  0xee   :  { %v904_v7 = vpop.f32.mrb[0].mxu0 }
  0xef   :  { %v159_v8 = vpop.f32.mrb[1].mxu0 }
  0xf0   :  { %v905_v9 = vpop.f32.mrb[2].mxu0 }
  0xf1   :  { %v175_v10 = vpack.c.bf16 %v905_v9, %v904_v7  ;;  %v162_v11 = vpop.f32.mrb[3].mxu0  ;;  %v87_v7 = vlaneseq }
  0xf2   :  { %v174_v12 = vpack.c.bf16 %v162_v11, %v159_v8  ;;  %v91_v8 = vpop.permute.xlu0 %90  ;;  %v63_v11 = vld [vmem:[#allocation2 + $0x80] sm:$0xff] }
  0xf3   :  { %v88_v9 = vand.u32 127, %v87_v7  ;;  %v76_v7 = vld [vmem:[#allocation2 + $0xd0] sm:$0xff] }
  0xf4   :  { %908 = vmatprep.mubr.msk.bf16.mxu1 %vm180_vm2, %v174_v12  ;;  %v64_v12 = vld [vmem:[#allocation2 + $0x88] sm:$0xff] }
  0xf5   :  { %909 = vmatmul.mubr.msk.bf16.vlgmr.msra.gmra.mrb[0].mxu1 %vm180_vm2, %v175_v10  ;;  %vm92_vm4 = vcmp.eq.s32.totalorder %v88_v9, %v91_v8  ;;  %v67_v13 = vpack.c.bf16 %v64_v12, %v63_v11  ;;  %v77_v9 = vld [vmem:[#allocation2 + $0xd8] sm:$0xff]  ;;  %v851_v11 = vld [vmem:[#allocation2 + $0xc0] ss:$0 sm:$0xff] }
  0xf6   :  { %913 = vmatpush3.bf16.msra.mxu1 %v49_v16  ;;  %v825_v10 = vsel %vm92_vm4, 1.0, %v1063_v46  ;;  %v68_v16 = vpack.c.bf16 %v66_v15, %v65_v14 }
  0xf7   :  { %914 = vmatprep.subr.bf16.mxu1 %v50_v18 }
  0xfa   :  { %915 = vmatpush3.bf16.msra.mxu1 %v50_v18 }
  0xfb   :  { %928 = vmatprep.subr.bf16.mxu1 %v55_v43 }
 0x1c8   :  { %v910_v20 = vpop.f32.mrb[0].mxu1 }
 0x1c9   :  { %v234_v21 = vadd.f32 %v910_v20, %v832_v19  ;;  %v225_v22 = vpop.f32.mrb[1].mxu1 }
 0x1ca   :  { %v226_v23 = vadd.f32 %v832_v19, %v225_v22  ;;  %v911_v24 = vpop.f32.mrb[2].mxu1 }
 0x1cb   :  { %1012 = vtanh.f32 %v234_v21  ;;  %v237_v25 = vadd.f32 %v911_v24, %v832_v19  ;;  %v228_v26 = vpop.f32.mrb[3].mxu1 }
 0x1cc   :  { %1014 = vtanh.f32 %v226_v23  ;;  %v229_v27 = vadd.f32 %v832_v19, %v228_v26 }
 0x1cd   :  { %1016 = vtanh.f32 %v237_v25 }
 0x1ce   :  { %1018 = vtanh.f32 %v229_v27 }
 0x1d5   :  { %v1013_v28 = vpop.eup %1012 }
 0x1d6   :  { %v1015_v29 = vpop.eup %1014 }
 0x1d7   :  { %v1017_v30 = vpop.eup %1016 }
 0x1d8   :  { %v1019_v31 = vpop.eup %1018  ;;  %v245_v32 = vpack.c.bf16 %v1017_v30, %v1013_v28 }
 0x1d9   :  { %v244_v33 = vpack.c.bf16 %v1019_v31, %v1015_v29 }
 0x1db   :  { %916 = vmatprep.mubr.msk.bf16.mxu1 %vm118_vm0, %v244_v33 }
 0x1dc   :  { %917 = vmatmul.mubr.msk.bf16.vlgmr.msra.gmra.mrb[4].mxu1 %vm118_vm0, %v245_v32 }
 0x1dd   :  { %929 = vmatpush3.bf16.msra.mxu1 %v55_v43 }
 0x1de   :  { %930 = vmatprep.subr.bf16.mxu1 %v56_v45 }
 0x1e1   :  { %931 = vmatpush3.bf16.msra.mxu1 %v56_v45 }
 0x1e2   :  { %944 = vmatprep.subr.bf16.mxu1 %v1063_v46 }
 0x2af   :  { %v918_v34 = vpop.f32.mrb[4].mxu1 }
 0x2b0   :  { %v286_v35 = vpop.f32.mrb[5].mxu1 }
 0x2b1   :  { %v919_v36 = vpop.f32.mrb[6].mxu1 }
 0x2b2   :  { %v302_v37 = vpack.c.bf16 %v919_v36, %v918_v34  ;;  %v289_v38 = vpop.f32.mrb[7].mxu1  ;;  %v60_v36 = vld [vmem:[#allocation2 + $0x78] sm:$0xff] }
 0x2b3   :  { %v301_v39 = vpack.c.bf16 %v289_v38, %v286_v35  ;;  %v59_v35 = vld [vmem:[#allocation2 + $0x70] sm:$0xff]  ;;  %v69_v38 = vld [vmem:[#allocation2 + $0xa0] sm:$0xff] }
 0x2b5   :  { %920 = vmatprep.subr.bf16.mxu0 %v301_v39 }
 0x2b6   :  { %921 = vmatpush3.bf16.msra.mxu0 %v301_v39  ;;  %v70_v39 = vld [vmem:[#allocation2 + $0xa8] sm:$0xff] }
 0x2b7   :  { %922 = vmatprep.subr.bf16.mxu0 %v302_v37  ;;  %v73_v42 = vpack.c.bf16 %v70_v39, %v69_v38 }
 0x2ba   :  { %923 = vmatpush3.bf16.msra.mxu0 %v302_v37  ;;  %v62_v37 = vpack.c.bf16 %v60_v36, %v59_v35 }
 0x2bd   :  { %925 = vmatmul.mubr.msk.bf16.vlgmr.msra.gmra.mrb[4].mxu0 %vm118_vm0, %v1124_v3 }
 0x2be   :  { %940 = vmatprep.mubr.msk.bf16.mxu0 %vm118_vm0, %v1117_v2 }
 0x390   :  { %v926_v48 = vpop.f32.mrb[4].mxu0 }
 0x391   :  { %v350_v49 = vadd.f32 %v926_v48, %v837_v47  ;;  %v341_v50 = vpop.f32.mrb[5].mxu0 }
 0x392   :  { %v342_v51 = vadd.f32 %v837_v47, %v341_v50  ;;  %v927_v52 = vpop.f32.mrb[6].mxu0 }
 0x393   :  { %1020 = vtanh.f32 %v350_v49  ;;  %v353_v53 = vadd.f32 %v927_v52, %v837_v47  ;;  %v344_v54 = vpop.f32.mrb[7].mxu0  ;;  %v71_v52 = vld [vmem:[#allocation2 + $0xb0] sm:$0xff] }
 0x394   :  { %1022 = vtanh.f32 %v342_v51  ;;  %v345_v55 = vadd.f32 %v837_v47, %v344_v54 }
 0x395   :  { %1024 = vtanh.f32 %v353_v53  ;;  %v72_v53 = vld [vmem:[#allocation2 + $0xb8] sm:$0xff] }
 0x396   :  { %1026 = vtanh.f32 %v345_v55  ;;  %v74_v54 = vpack.c.bf16 %v72_v53, %v71_v52 }
 0x39d   :  { %v1021_v56 = vpop.eup %1020 }
 0x39e   :  { %v1023_v57 = vpop.eup %1022 }
 0x39f   :  { %v1025_v58 = vpop.eup %1024 }
 0x3a0   :  { %v1027_v59 = vpop.eup %1026  ;;  %v361_v60 = vpack.c.bf16 %v1025_v58, %v1021_v56 }
 0x3a1   :  { %v360_v61 = vpack.c.bf16 %v1027_v59, %v1023_v57 }
 0x3a3   :  { %932 = vmatprep.mubr.msk.bf16.mxu1 %vm118_vm0, %v360_v61 }
 0x3a4   :  { %933 = vmatmul.mubr.msk.bf16.vlgmr.msra.gmra.mrb[8].mxu1 %vm118_vm0, %v361_v60 }
 0x3a5   :  { %945 = vmatpush3.bf16.msra.mxu1 %v244_v33  ;;  %948 = vmatprep.mubr.msk.bf16.mxu1 %vm1065_vm3, %v1063_v46  ;;  %v58_v33 = vld [vmem:[#allocation2 + $0x68] sm:$0xff] }
 0x3a6   :  { %946 = vmatprep.subr.bf16.mxu1 %v1063_v46 }
 0x3a9   :  { %947 = vmatpush3.bf16.msra.mxu1 %v245_v32  ;;  %v57_v32 = vld [vmem:[#allocation2 + $0x60] sm:$0xff] }
 0x3aa   :  { %960 = vmatprep.subr.bf16.mxu1 %v1063_v46  ;;  %v61_v34 = vpack.c.bf16 %v58_v33, %v57_v32 }
 0x477   :  { %v934_v0 = vpop.f32.mrb[8].mxu1 }
 0x478   :  { %v402_v1 = vpop.f32.mrb[9].mxu1 }
 0x479   :  { %v935_v2 = vpop.f32.mrb[10].mxu1 }
 0x47a   :  { %v418_v4 = vpack.c.bf16 %v935_v2, %v934_v0  ;;  %v405_v5 = vpop.f32.mrb[11].mxu1 }
 0x47b   :  { %v417_v6 = vpack.c.bf16 %v405_v5, %v402_v1 }
 0x47d   :  { %936 = vmatprep.subr.bf16.mxu0 %v417_v6 }
 0x47e   :  { %937 = vmatpush3.bf16.msra.mxu0 %v417_v6  ;;  %v75_v6 = vld [vmem:[#allocation2 + $0xc8] sm:$0xff] }
 0x47f   :  { %938 = vmatprep.subr.bf16.mxu0 %v418_v4  ;;  %v79_v8 = vpack.c.bf16 %v76_v7, %v75_v6 }
 0x482   :  { %939 = vmatpush3.bf16.msra.mxu0 %v418_v4 }
 0x483   :  { %952 = vmatprep.subr.bf16.mxu0 %v1063_v46 }
 0x485   :  { %941 = vmatmul.mubr.msk.bf16.vlgmr.msra.gmra.mrb[8].mxu0 %vm118_vm0, %v1124_v3  ;;  %v95_v3 = vpack.c.bf16 %v825_v10, %v825_v10  ;;  %v78_v10 = vld [vmem:[#allocation2 + $0xe0] sm:$0xff] }
 0x486   :  { %953 = vmatpush3.bf16.msra.mxu0 %v360_v61  ;;  %956 = vmatprep.mubr.msk.bf16.mxu0 %vm1065_vm3, %v1063_v46 }
 0x487   :  { %954 = vmatprep.subr.bf16.mxu0 %v1063_v46  ;;  %949 = vmatmul.mubr.msk.bf16.vlgmr.msra.gmra.mrb[12].mxu1 %vm118_vm0, %v95_v3 }
 0x488   :  { %964 = vmatprep.mubr.msk.bf16.mxu1 %vm1065_vm3, %v1063_v46 }
 0x48a   :  { %955 = vmatpush3.bf16.msra.mxu0 %v361_v60 }
 0x48b   :  { %968 = vmatprep.subr.bf16.mxu0 %v1063_v46 }
 0x48d   :  { %957 = vmatmul.mubr.msk.bf16.vlgmr.msra.gmra.mrb[12].mxu0 %vm118_vm0, %v95_v3 }
 0x48e   :  { %972 = vmatprep.mubr.msk.bf16.mxu0 %vm1065_vm3, %v1063_v46  ;;  %969 = vmatpush3.bf16.msra.mxu0 %v67_v13 }
 0x48f   :  { %970 = vmatprep.subr.bf16.mxu0 %v1063_v46 }
 0x492   :  { %971 = vmatpush3.bf16.msra.mxu0 %v68_v16 }
 0x493   :  { %984 = vmatprep.subr.bf16.mxu0 %v1063_v46 }
 0x558   :  { %v942_v18 = vpop.f32.mrb[8].mxu0 }
 0x559   :  { %v466_v19 = vadd.f32 %v942_v18, %v842_v17  ;;  %v457_v20 = vpop.f32.mrb[9].mxu0 }
 0x55a   :  { %v458_v21 = vadd.f32 %v842_v17, %v457_v20  ;;  %v943_v22 = vpop.f32.mrb[10].mxu0  ;;  %v515_v40 = vpop.f32.mrb[12].mxu1  ;;  %v852_v20 = vld [vmem:[#allocation2 + $0xe8] ss:$0 sm:$0xff] }
 0x55b   :  { %1028 = vtanh.f32 %v466_v19  ;;  %v469_v23 = vadd.f32 %v943_v22, %v842_v17  ;;  %v460_v24 = vpop.f32.mrb[11].mxu0  ;;  %v521_v43 = vpack.c.bf16 %v515_v40, %v515_v40  ;;  %v950_v45 = vpop.f32.mrb[13].mxu1 }
 0x55c   :  { %1030 = vtanh.f32 %v458_v21  ;;  %v461_v25 = vadd.f32 %v842_v17, %v460_v24  ;;  %v518_v48 = vpop.f32.mrb[14].mxu1 }
 0x55d   :  { %1032 = vtanh.f32 %v469_v23  ;;  %v951_v50 = vpop.f32.mrb[15].mxu1 }
 0x55e   :  { %1034 = vtanh.f32 %v461_v25 }
 0x560   :  { %v556_v41 = vpop.f32.mrb[12].mxu0 }
 0x561   :  { %v562_v44 = vpack.c.bf16 %v556_v41, %v556_v41  ;;  %v958_v47 = vpop.f32.mrb[13].mxu0 }
 0x562   :  { %v559_v49 = vpop.f32.mrb[14].mxu0 }
 0x563   :  { %v959_v51 = vpop.f32.mrb[15].mxu0  ;;  %973 = vmatmul.mubr.msk.bf16.vlgmr.msra.gmra.mrb[16].mxu0 %vm118_vm0, %v562_v44 }
 0x564   :  { %985 = vmatpush3.bf16.msra.mxu0 %v73_v42  ;;  %988 = vmatprep.mubr.msk.bf16.mxu0 %vm1065_vm3, %v1063_v46 }
 0x565   :  { %v1029_v26 = vpop.eup %1028  ;;  %986 = vmatprep.subr.bf16.mxu0 %v1063_v46 }
 0x566   :  { %v1031_v27 = vpop.eup %1030 }
 0x567   :  { %v1033_v28 = vpop.eup %1032 }
 0x568   :  { %v1035_v29 = vpop.eup %1034  ;;  %v477_v30 = vpack.c.bf16 %v1033_v28, %v1029_v26  ;;  %987 = vmatpush3.bf16.msra.mxu0 %v74_v54 }
 0x569   :  { %v476_v31 = vpack.c.bf16 %v1035_v29, %v1031_v27 }
 0x56b   :  { %961 = vmatpush3.bf16.msra.mxu1 %v476_v31 }
 0x56c   :  { %962 = vmatprep.subr.bf16.mxu1 %v1063_v46 }
 0x56f   :  { %963 = vmatpush3.bf16.msra.mxu1 %v477_v30 }
 0x570   :  { %976 = vmatprep.subr.bf16.mxu1 %v1063_v46 }
 0x572   :  { %965 = vmatmul.mubr.msk.bf16.vlgmr.msra.gmra.mrb[16].mxu1 %vm118_vm0, %v95_v3  ;;  %v80_v3 = vpack.c.bf16 %v78_v10, %v77_v9 }
 0x573   :  { %977 = vmatpush3.bf16.msra.mxu1 %v61_v34  ;;  %980 = vmatprep.mubr.msk.bf16.mxu1 %vm1065_vm3, %v1063_v46 }
 0x574   :  { %978 = vmatprep.subr.bf16.mxu1 %v1063_v46 }
 0x577   :  { %979 = vmatpush3.bf16.msra.mxu1 %v62_v37 }
 0x578   :  { %992 = vmatprep.subr.bf16.mxu1 %v1063_v46 }
 0x57a   :  { %981 = vmatmul.mubr.msk.bf16.vlgmr.msra.gmra.mrb[20].mxu1 %vm118_vm0, %v521_v43 }
 0x57b   :  { %996 = vmatprep.mubr.msk.bf16.mxu1 %vm1065_vm3, %v1063_v46  ;;  %993 = vmatpush3.bf16.msra.mxu1 %v79_v8 }
 0x57c   :  { %994 = vmatprep.subr.bf16.mxu1 %v1063_v46  ;;  %v788_v46 = vld [vmem:[%s1196_s4] sm:$0xf] }
 0x57f   :  { %995 = vmatpush3.bf16.msra.mxu1 %v80_v3 }
 0x636   :  { %v641_v60 = vpop.f32.mrb[16].mxu0 }
 0x637   :  { %v974_v63 = vpop.f32.mrb[17].mxu0 }
 0x638   :  { %v644_v1 = vpop.f32.mrb[18].mxu0 }
 0x639   :  { %v975_v4 = vpop.f32.mrb[19].mxu0 }
 0x645   :  { %v597_v55 = vpop.f32.mrb[16].mxu1 }
 0x646   :  { %v603_v56 = vpack.c.bf16 %v597_v55, %v597_v55  ;;  %v966_v57 = vpop.f32.mrb[17].mxu1 }
 0x647   :  { %v600_v58 = vpop.f32.mrb[18].mxu1 }
 0x648   :  { %v967_v59 = vpop.f32.mrb[19].mxu1  ;;  %989 = vmatmul.mubr.msk.bf16.vlgmr.msra.gmra.mrb[20].mxu0 %vm118_vm0, %v603_v56 }
 0x64d   :  { %v684_v61 = vpop.f32.mrb[20].mxu1 }
 0x64e   :  { %v685_v62 = vadd.f32 %v684_v61, %v641_v60  ;;  %v982_v0 = vpop.f32.mrb[21].mxu1 }
 0x64f   :  { %v687_v2 = vpop.f32.mrb[22].mxu1 }
 0x650   :  { %v983_v5 = vpop.f32.mrb[23].mxu1 }
 0x71b   :  { %v727_v12 = vpop.f32.mrb[20].mxu0 }
 0x71c   :  { %v733_v13 = vadd.f32 %v727_v12, %v685_v62  ;;  %v990_v14 = vpop.f32.mrb[21].mxu0 }
 0x71d   :  { %v730_v15 = vpop.f32.mrb[22].mxu0 }
 0x71e   :  { %v738_v16 = vadd.f32 %v851_v11, %v733_v13  ;;  %v991_v17 = vpop.f32.mrb[23].mxu0 }
 0x720   :  { %v739_v18 = vmax.f32 %v738_v16, 0.0 }
 0x722   :  { %v740_v19 = vpack.c.bf16 %v739_v18, %v739_v18 }
 0x724   :  { %997 = vmatmul.mubr.msk.bf16.vlgmr.msra.gmra.mrb[24].mxu1 %vm118_vm0, %v740_v19 }
 0x7f7   :  { %v782_v21 = vpop.f32.mrb[24].mxu1 }
 0x7f8   :  { %v783_v22 = vadd.f32 %v852_v20, %v782_v21  ;;  %v998_v23 = vpop.f32.mrb[25].mxu1 }
 0x7f9   :  { %v785_v24 = vpop.f32.mrb[26].mxu1 }
 0x7fa   :  { %v789_v25 = vsub.f32 %v783_v22, %v788_v46  ;;  %v999_v26 = vpop.f32.mrb[27].mxu1 }
 0x7fc   :  { %v802_v27 = vand.u32 2147483647, %v789_v25  ;;  %v790_v28 = vmul.f32 %v789_v25, %v789_v25 }
 0x7fe   :  { %v803_v29 = vsel %vm187_vm1, %v802_v27, 0.0  ;;  %v791_v30 = vsel %vm187_vm1, %v790_v28, 0.0 }
 0x7ff   :  { %804 = vadd.xlane.f32.xlu1 %v803_v29  ;;  %792 = vadd.xlane.f32.xlu0 %v791_v30 }
 0x88c   :  { %v805_v31 = vpop.xlane.xlu1 %804  ;;  %v793_v32 = vpop.xlane.xlu0 %792 }
 0x88d   :  { %v806_v33 = vsel %vm187_vm1, %v805_v31, 0.0  ;;  %v794_v34 = vsel %vm187_vm1, %v793_v32, 0.0 }
 0x88e   :  { %v807_v35 = vrot.slane %v806_v33, 4  ;;  %v795_v36 = vrot.slane %v794_v34, 4 }
 0x890   :  { %v808_v37 = vadd.f32 %v807_v35, %v806_v33  ;;  %v796_v38 = vadd.f32 %v795_v36, %v794_v34 }
 0x892   :  { %v809_v39 = vrot.slane %v808_v37, 2  ;;  %v797_v40 = vrot.slane %v796_v38, 2 }
 0x894   :  { %v810_v41 = vadd.f32 %v809_v39, %v808_v37  ;;  %v798_v42 = vadd.f32 %v797_v40, %v796_v38 }
 0x896   :  { %v811_v43 = vrot.slane %v810_v41, 1  ;;  %v799_v44 = vrot.slane %v798_v42, 1 }
 0x898   :  { %v812_v45 = vadd.f32 %v811_v43, %v810_v41  ;;  %v800_v47 = vadd.f32 %v799_v44, %v798_v42 }
 0x89a   :  { %v813_v48 = vmul.f32 0.25, %v812_v45  ;;  %v801_v49 = vmul.f32 0.25, %v800_v47 }
 0x89c   :  { %v814_v50 = vsel %vm187_vm1, %v783_v22, %v801_v49 }
 0x89d   :  { %v816_v51 = vsel %vm815_vm5, %v814_v50, %v813_v48 }
 0x89e   :  { %v818_v52 = vsel %vm817_vm6, %v816_v51, 0.0 }
 0x89f   :  { %819 = vst [vmem:[%s1197_s5] sm:$0xff] %v818_v52 }
 0x8a0   :  { %824 = vsyncpa [#allocation3], 1 }

</bundles_post_ra>
